<compile_context>
chip_gen: v6e
topology: v6e:2x2x1
jax: 0.10.0
libtpu: 0.0.40
codegen_flags: <defaults>
</compile_context>

<pallas_src>
from functools import partial

import jax
import jax.numpy as jnp
from jax import lax
from jax.experimental import pallas as pl
from jax.experimental.pallas import tpu as pltpu

_LANE = 128
_SUBLANE = 8


def _round_up(v, m):
    return ((v + m - 1) // m) * m


def _mlp_kernel(x_ref, w1_ref, b1_ref, w2_ref, b2_ref, o_ref, *, compute_dtype, precision):
    # Cast x to the MXU compute dtype *inside* the kernel (wrapper passes raw f32).
    x = x_ref[...].astype(compute_dtype)
    # Layer 1: MXU matmul, f32 accumulation; bias-add + ReLU in f32 on the VPU.
    h = jnp.dot(x, w1_ref[...], preferred_element_type=jnp.float32, precision=precision)
    h = jnp.maximum(h + b1_ref[...], 0.0)
    # Layer 2: downcast activations to the weight dtype only at the MXU input
    # (no-op in f32 mode); accumulation is still f32.
    out = jnp.dot(h.astype(w2_ref.dtype), w2_ref[...],
                  preferred_element_type=jnp.float32, precision=precision)
    o_ref[...] = (out + b2_ref[...]).astype(o_ref.dtype)


def prepare_linear_q_params(w1, b1, w2, b2, *, compute_dtype=jnp.bfloat16):
    """Pad/cast weights once (lane-dense features, zero padding is exact math).

    w1: (K, H)  b1: (1, H) or (H,)   w2: (H, N)  b2: (1, N) or (N,)
    """
    K, H = w1.shape
    N = w2.shape[1]
    Hp = _round_up(max(H, _LANE), _LANE)
    Np = _round_up(max(N, _LANE), _LANE)

    w1p = jnp.pad(w1, ((0, 0), (0, Hp - H))).astype(compute_dtype)
    b1p = jnp.pad(jnp.reshape(b1, (1, H)), ((0, 0), (0, Hp - H))).astype(jnp.float32)
    w2p = jnp.pad(w2, ((0, Hp - H), (0, Np - N))).astype(compute_dtype)
    b2p = jnp.pad(jnp.reshape(b2, (1, N)), ((0, 0), (0, Np - N))).astype(jnp.float32)

    return dict(w1=w1p, b1=b1p, w2=w2p, b2=b2p,
                in_features=K, hidden_padded=Hp, out_features=N, out_padded=Np,
                compute_dtype=jnp.dtype(compute_dtype))


def linear_q_forward(x, params, *, block_b=2048, out_dtype=jnp.bfloat16):
    """Fused Linear->ReLU->Linear forward as a single batched Pallas kernel.

    x: (B, K) float32. Returns (B, N) in out_dtype.
    """
    B, K = x.shape
    assert K == params["in_features"]
    Hp, N, Np = params["hidden_padded"], params["out_features"], params["out_padded"]
    w1p, b1p, w2p, b2p = params["w1"], params["b1"], params["w2"], params["b2"]
    compute_dtype = params["compute_dtype"]

    # f32 mode must stay true f32 on the MXU for the exactness guarantee.
    precision = (lax.Precision.HIGHEST
                 if compute_dtype == jnp.dtype(jnp.float32) else None)

    # Batch tile: big enough to amortize per-step overhead; when the whole batch fits in
    # one tile, try to split it in two sublane-aligned steps so both v7x TCs get work.
    if B > block_b:
        tb = block_b                       # multiple of 8; ragged last tile is masked
    else:
        tb_half = _round_up(-(-B // 2), _SUBLANE)
        tb = tb_half if tb_half < B else B  # tb == B (full dim) is always legal
    grid_b = pl.cdiv(B, tb)

    out_dtype = jnp.dtype(out_dtype)
    flops = 2 * B * (K * Hp + Hp * Np)
    bytes_accessed = (x.size * x.dtype.itemsize
                      + w1p.size * w1p.dtype.itemsize + b1p.size * b1p.dtype.itemsize
                      + w2p.size * w2p.dtype.itemsize + b2p.size * b2p.dtype.itemsize
                      + B * Np * out_dtype.itemsize)

    kernel = partial(_mlp_kernel, compute_dtype=compute_dtype, precision=precision)

    out = pl.pallas_call(
        kernel,
        out_shape=jax.ShapeDtypeStruct((B, Np), out_dtype),
        grid_spec=pltpu.PrefetchScalarGridSpec(
            num_scalar_prefetch=0,
            grid=(grid_b,),
            in_specs=[
                pl.BlockSpec((tb, K), lambda i: (i, 0)),    # x: tiled along batch, raw f32
                pl.BlockSpec((K, Hp), lambda i: (0, 0)),    # w1: VMEM-resident
                pl.BlockSpec((1, Hp), lambda i: (0, 0)),    # b1: VMEM-resident
                pl.BlockSpec((Hp, Np), lambda i: (0, 0)),   # w2: VMEM-resident
                pl.BlockSpec((1, Np), lambda i: (0, 0)),    # b2: VMEM-resident
            ],
            out_specs=pl.BlockSpec((tb, Np), lambda i: (i, 0)),
        ),
        compiler_params=pltpu.CompilerParams(
            # VMEM at tb=2048 is only a few MiB; no vmem_limit_bytes override needed.
            dimension_semantics=("parallel",)),
        cost_estimate=pl.CostEstimate(flops=flops, transcendentals=0,
                                      bytes_accessed=bytes_accessed),
    )(x, w1p, b1p, w2p, b2p)

    return out[:, :N]


def init_linear_q_params(key, input_size, hidden_size, output_size, dtype=jnp.float32):
    """Deterministic init mimicking nn.Linear default (uniform +-1/sqrt(fan_in))."""
    k1, k2, k3, k4 = jax.random.split(key, 4)
    bound1 = 1.0 / jnp.sqrt(jnp.float32(input_size))
    bound2 = 1.0 / jnp.sqrt(jnp.float32(hidden_size))
    w1 = jax.random.uniform(k1, (input_size, hidden_size), dtype, -bound1, bound1)
    b1 = jax.random.uniform(k2, (1, hidden_size), dtype, -bound1, bound1)
    w2 = jax.random.uniform(k3, (hidden_size, output_size), dtype, -bound2, bound2)
    b2 = jax.random.uniform(k4, (1, output_size), dtype, -bound2, bound2)
    return w1, b1, w2, b2


if __name__ == "__main__":
    # SnakeAI's Linear_Q is typically Linear_Q(11, 256, 3); use small demo shapes here.
    batch, input_size, hidden_size, output_size = 8, 11, 32, 3

    key = jax.random.PRNGKey(0)
    kx, kp = jax.random.split(key)
    x = jax.random.normal(kx, (batch, input_size), jnp.float32)
    w1, b1, w2, b2 = init_linear_q_params(kp, input_size, hidden_size, output_size)

    # f32 reference (HIGHEST precision so the f32 exactness check below is robust).
    h_ref = jnp.maximum(jnp.dot(x, w1, precision=lax.Precision.HIGHEST) + b1, 0.0)
    ref = jnp.dot(h_ref, w2, precision=lax.Precision.HIGHEST) + b2

    # Default (inference) path: bf16 MXU inputs, bf16 writeback.
    params_bf16 = prepare_linear_q_params(w1, b1, w2, b2, compute_dtype=jnp.bfloat16)
    out = jax.block_until_ready(linear_q_forward(x, params_bf16))
    assert out.shape == (batch, output_size)
    assert jnp.allclose(out.astype(jnp.float32), ref, atol=3e-2, rtol=3e-2), (
        f"max abs err {jnp.max(jnp.abs(out.astype(jnp.float32) - ref))}")

    # Full-f32 path (no bf16 rounding anywhere): exact vs reference.
    params_f32 = prepare_linear_q_params(w1, b1, w2, b2, compute_dtype=jnp.float32)
    out_f32 = jax.block_until_ready(
        linear_q_forward(x, params_f32, out_dtype=jnp.float32))
    assert jnp.allclose(out_f32, ref, atol=1e-5, rtol=1e-5), (
        f"max abs err {jnp.max(jnp.abs(out_f32 - ref))}")

    print("KERNEL_OK")
</pallas_src>

<mosaic_0001>
module attributes {stable_mosaic.version = 11 : i64} {
  func.func @_mlp_kernel(%arg0: i32, %arg1: memref<8x11xf32, #tpu.memory_space<vmem>>, %arg2: memref<11x128xbf16, #tpu.memory_space<vmem>>, %arg3: memref<1x128xf32, #tpu.memory_space<vmem>>, %arg4: memref<128x128xbf16, #tpu.memory_space<vmem>>, %arg5: memref<1x128xf32, #tpu.memory_space<vmem>>, %arg6: memref<8x128xbf16, #tpu.memory_space<vmem>>) attributes {dimension_semantics = [#tpu.dimension_semantics<parallel>], iteration_bounds = array<i64: 1>, scalar_prefetch = 0 : i64, scratch_operands = 0 : i64, tpu.core_type = #tpu.core_type<tc>, window_params = [{transform_indices = @transform_0, window_bounds = array<i64: 8, 11>}, {pipeline_mode = #tpu.pipeline_mode<synchronous>, transform_indices = @transform_1, window_bounds = array<i64: 11, 128>}, {pipeline_mode = #tpu.pipeline_mode<synchronous>, transform_indices = @transform_2, window_bounds = array<i64: 1, 128>}, {pipeline_mode = #tpu.pipeline_mode<synchronous>, transform_indices = @transform_3, window_bounds = array<i64: 128, 128>}, {pipeline_mode = #tpu.pipeline_mode<synchronous>, transform_indices = @transform_4, window_bounds = array<i64: 1, 128>}, {transform_indices = @transform_5, window_bounds = array<i64: 8, 128>}]} {
    %c0 = arith.constant 0 : index
    %c0_0 = arith.constant 0 : index
    %0 = vector.load %arg1[%c0, %c0_0] : memref<8x11xf32, #tpu.memory_space<vmem>>, vector<8x11xf32>
    %1 = arith.truncf %0 : vector<8x11xf32> to vector<8x11xbf16>
    %c0_1 = arith.constant 0 : index
    %c0_2 = arith.constant 0 : index
    %2 = vector.load %arg2[%c0_1, %c0_2] : memref<11x128xbf16, #tpu.memory_space<vmem>>, vector<11x128xbf16>
    %cst = arith.constant dense<0.000000e+00> : vector<8x128xf32>
    %3 = tpu.matmul %1, %2, %cst {dimension_numbers = #tpu.dot_dimension_numbers<[1], [0], [0], [1], [0, 0, 1, 1], [], []>} : vector<8x11xbf16>, vector<11x128xbf16>, vector<8x128xf32> -> vector<8x128xf32>
    %c0_3 = arith.constant 0 : index
    %c0_4 = arith.constant 0 : index
    %4 = vector.load %arg3[%c0_3, %c0_4] : memref<1x128xf32, #tpu.memory_space<vmem>>, vector<1x128xf32>
    %5 = vector.broadcast %4 : vector<1x128xf32> to vector<8x128xf32>
    %6 = arith.addf %3, %5 : vector<8x128xf32>
    %cst_5 = arith.constant 0.000000e+00 : f32
    %7 = vector.broadcast %cst_5 : f32 to vector<8x128xf32>
    %8 = arith.maximumf %6, %7 : vector<8x128xf32>
    %9 = arith.truncf %8 : vector<8x128xf32> to vector<8x128xbf16>
    %c0_6 = arith.constant 0 : index
    %c0_7 = arith.constant 0 : index
    %10 = vector.load %arg4[%c0_6, %c0_7] : memref<128x128xbf16, #tpu.memory_space<vmem>>, vector<128x128xbf16>
    %cst_8 = arith.constant dense<0.000000e+00> : vector<8x128xf32>
    %11 = tpu.matmul %9, %10, %cst_8 {dimension_numbers = #tpu.dot_dimension_numbers<[1], [0], [0], [1], [0, 0, 1, 1], [], []>} : vector<8x128xbf16>, vector<128x128xbf16>, vector<8x128xf32> -> vector<8x128xf32>
    %c0_9 = arith.constant 0 : index
    %c0_10 = arith.constant 0 : index
    %12 = vector.load %arg5[%c0_9, %c0_10] : memref<1x128xf32, #tpu.memory_space<vmem>>, vector<1x128xf32>
    %13 = vector.broadcast %12 : vector<1x128xf32> to vector<8x128xf32>
    %14 = arith.addf %11, %13 : vector<8x128xf32>
    %15 = arith.truncf %14 : vector<8x128xf32> to vector<8x128xbf16>
    %c0_11 = arith.constant 0 : index
    %c0_12 = arith.constant 0 : index
    %16 = vector.load %arg6[%c0_11, %c0_12] : memref<8x128xbf16, #tpu.memory_space<vmem>>, vector<8x128xbf16>
    tpu.vector_store %arg6[%c0_11, %c0_12], %15 {strides = array<i32>} : memref<8x128xbf16, #tpu.memory_space<vmem>>, vector<8x128xbf16>,
    return
  }
  func.func @transform_0(%arg0: i32) -> (i32, i32) {
    %c0_i32 = arith.constant 0 : i32
    %c0_i32_0 = arith.constant 0 : i32
    return %arg0, %c0_i32 : i32, i32
  }
  func.func @transform_1(%arg0: i32) -> (i32, i32) {
    %c0_i32 = arith.constant 0 : i32
    %c0_i32_0 = arith.constant 0 : i32
    %c0_i32_1 = arith.constant 0 : i32
    return %c0_i32, %c0_i32_0 : i32, i32
  }
  func.func @transform_2(%arg0: i32) -> (i32, i32) {
    %c0_i32 = arith.constant 0 : i32
    %c0_i32_0 = arith.constant 0 : i32
    %c0_i32_1 = arith.constant 0 : i32
    return %c0_i32, %c0_i32_0 : i32, i32
  }
  func.func @transform_3(%arg0: i32) -> (i32, i32) {
    %c0_i32 = arith.constant 0 : i32
    %c0_i32_0 = arith.constant 0 : i32
    %c0_i32_1 = arith.constant 0 : i32
    return %c0_i32, %c0_i32_0 : i32, i32
  }
  func.func @transform_4(%arg0: i32) -> (i32, i32) {
    %c0_i32 = arith.constant 0 : i32
    %c0_i32_0 = arith.constant 0 : i32
    %c0_i32_1 = arith.constant 0 : i32
    return %c0_i32, %c0_i32_0 : i32, i32
  }
  func.func @transform_5(%arg0: i32) -> (i32, i32) {
    %c0_i32 = arith.constant 0 : i32
    %c0_i32_0 = arith.constant 0 : i32
    return %arg0, %c0_i32 : i32, i32
  }
}

</mosaic_0001>

<bundles_post_ra>
// kernel: tpu_custom_call.1
= control target key start
LH: loop header
LB: loop body
LE: loop exit
PB: predicated region body
PF: predicated region fallthrough
CT: control target
= control target key end

     0   :  { %10 = vsyncpa [#allocation3], 0  ;;  %s469_s0 = inlined_call_operand.hbm [shape: f32[8,11], index: 0, kind: input, shape index: {}]   ;;  %s470_s1 = inlined_call_operand.hbm [shape: bf16[11,128], index: 1, kind: input, shape index: {}]   ;;  %s471_s2 = inlined_call_operand.vmem [shape: f32[1,128], index: 2, kind: input, shape index: {}]   ;;  %s472_s3 = inlined_call_operand.hbm [shape: bf16[128,128], index: 3, kind: input, shape index: {}]   ;;  %s473_s4 = inlined_call_operand.vmem [shape: f32[1,128], index: 4, kind: input, shape index: {}]   ;;  %s474_s5 = inlined_call_operand.hbm [shape: bf16[8,128], index: 5, kind: output, shape index: {}]  }
   0x1   :  { %11 = vsyncpa [#allocation6], 0 }
   0x2   :  { %12 = vsyncpa [#allocation4], 0  ;;  %s412_s18 = smov [#allocation5]  }
   0x3   :  { %s28_s19 = sshll.u32 %s412_s18, 4  ;;  %s29_s19 = int_to_ptr.vmem [resolvable:$true] %s28_s19 }
   0x4   :  { %s334_s20 = scalar_lea.vmem %s29_s19, 128  ;;  %p339_p1 = scmp.lt.s32.totalorder %s29_s19, %s29_s19 }
   0x5   :  { %p335_p0 = scmp.ne.s32.totalorder %s29_s19, %s334_s20  ;;  %p340_p2 = scmp.lt.s32.totalorder %s334_s20, %s334_s20 }
   0x7   :  { %p341_p3 = por %p340_p2, %p339_p1 }
   0x9   :  { %p342_p4 = pnand %p341_p3, %p335_p0 }
   0xb   :  { %345 = shalt.err (!%p342_p4)
}
   0xc   :  { %s413_s21 = smov 64   ;;  %s414_s22 = smov 4  }
   0xd   :  { %34 = dma.hbm_to_vmem [thread:$0]  %s470_s1, 128, %s29_s19, [#allocation6], %s413_s21, %s413_s21, %s414_s22  }
   0xe   :  { %s415_s25 = smov [#allocation2]   ;;  %s416_s27 = smov [#allocation7]  }
   0xf   :  { %s19_s26 = sshll.u32 %s415_s25, 4  ;;  %s42_s28 = sshll.u32 %s416_s27, 4  ;;  %s20_s26 = int_to_ptr.vmem [resolvable:$true] %s19_s26  ;;  %s43_s28 = int_to_ptr.vmem [resolvable:$true] %s42_s28 }
  0x10   :  { %s354_s29 = scalar_lea.vmem %s20_s26, 128  ;;  %p359_p6 = scmp.lt.s32.totalorder %s20_s26, %s20_s26 }
  0x11   :  { %p355_p5 = scmp.ne.s32.totalorder %s20_s26, %s354_s29  ;;  %p360_p7 = scmp.lt.s32.totalorder %s354_s29, %s354_s29 }
  0x13   :  { %p361_p8 = por %p360_p7, %p359_p6 }
  0x15   :  { %p362_p9 = pnand %p361_p8, %p355_p5 }
  0x17   :  { %365 = shalt.err (!%p362_p9)
}
  0x18   :  { %22 = dma.hbm_to_vmem [thread:$0]  %s469_s0, 128, %s20_s26, [#allocation3]  }
  0x19   :  { %s374_s7 = scalar_lea.vmem %s43_s28, 1024  ;;  %p379_p11 = scmp.lt.s32.totalorder %s43_s28, %s43_s28 }
  0x1a   :  { %p375_p10 = scmp.ne.s32.totalorder %s43_s28, %s374_s7  ;;  %p380_p12 = scmp.lt.s32.totalorder %s374_s7, %s374_s7 }
  0x1c   :  { %p381_p13 = por %p380_p12, %p379_p11 }
  0x1e   :  { %p382_p0 = pnand %p381_p13, %p375_p10 }
  0x20   :  { %385 = shalt.err (!%p382_p0)
}
  0x21   :  { %48 = dma.hbm_to_vmem [thread:$0]  %s472_s3, 1024, %s43_s28, [#allocation6], %s413_s21, %s413_s21, %s414_s22  }
  0x22   :  { %406 = dma.done.wait [#allocation3], 128  }
  0x23   :  { %407 = vsyncadd [#allocation3], 4294967168 }
  0x24   :  { %408 = dma.done.wait [#allocation6], 1152  }
  0x25   :  { %409 = vsyncadd [#allocation6], 4294966144  ;;  %vm81_vm0 = vcmask 1044480   ;;  %v417_v0 = vmov 0.0   ;;  %vm418_vm1 = vmmov 0   ;;  %vm82_vm2 = vcmask 1045504  }
  0x26   :  { %282 = vmatprep.subr.bf16.mxu0 %v417_v0  ;;  %288 = vmatprep.subr.bf16.mxu1 %v417_v0  ;;  %v419_v1 = vmov 65535   ;;  %v317_v4 = vld [vmem:[#allocation5] sm:$0x3f]   ;;  %v61_v5 = vld [vmem:[#allocation2] sm:$0xff]  ;;  %vm77_vm3 = vcmask 89088   ;;  %v320_v10 = vld [vmem:[#allocation7 + $0x28] sm:$0xff]  }
  0x27   :  { %284 = vmatprep.mubr.msk.bf16.mxu0 %vm418_vm1, %v417_v0  ;;  %304 = vmatprep.mubr.msk.bf16.mxu1 %vm418_vm1, %v417_v0  ;;  %v83_v2 = vsel %vm81_vm0, 4294967295, %v419_v1  ;;  %v318_v7 = vld [vmem:[#allocation7 + $0x38] sm:$0xff]   ;;  %v62_v8 = vpack.c.bf16 %v61_v5, %v61_v5  ;;  %v319_v9 = vld [vmem:[#allocation7 + $0x30] sm:$0xff]   ;;  %v321_v11 = vld [vmem:[#allocation7 + $0x20] sm:$0xff]   ;;  %s420_s11 = smov [#allocation8]  }
  0x28   :  { %v84_v3 = vsel %vm82_vm2, %v83_v2, 0  ;;  %289 = vmatpush3.bf16.msra.mxu1 %v318_v7  ;;  %v322_v12 = vld [vmem:[#allocation7 + $0x18] sm:$0xff]   ;;  %v323_v13 = vld [vmem:[#allocation7 + $0x10] sm:$0xff]   ;;  %v324_v14 = vld [vmem:[#allocation7 + $0x8] sm:$0xff]   ;;  %s249_s12 = sshll.u32 %s420_s11, 4  ;;  %s250_s12 = int_to_ptr.vmem [resolvable:$true] %s249_s12 }
  0x29   :  { %v86_v6 = vand.u32 %v317_v4, %v84_v3  ;;  %290 = vmatprep.subr.bf16.mxu1 %v417_v0  ;;  %v325_v15 = vld [vmem:[#allocation7] sm:$0xff]   ;;  %v259_v16 = vld [vmem:[%s471_s2] ss:$0 sm:$0xff]  ;;  %s386_s2 = scalar_lea.vmem %s250_s12, 64  ;;  %p391_p2 = scmp.lt.s32.totalorder %s250_s12, %s250_s12 }
  0x2a   :  { %v262_v24 = vld [vmem:[%s473_s4] ss:$0 sm:$0xff]  ;;  %p387_p1 = scmp.ne.s32.totalorder %s250_s12, %s386_s2  ;;  %p392_p3 = scmp.lt.s32.totalorder %s386_s2, %s386_s2 }
  0x2b   :  { %283 = vmatpush3.bf16.msra.mxu0 %v86_v6 }
  0x2c   :  { %291 = vmatpush3.bf16.msra.mxu1 %v319_v9  ;;  %p393_p4 = por %p392_p3, %p391_p2 }
  0x2d   :  { %292 = vmatprep.subr.bf16.mxu1 %v417_v0 }
  0x2e   :  { %285 = vmatmul.mubr.msk.bf16.vlgmr.msra.gmra.mxu0 %vm77_vm3, %v62_v8  ;;  %p394_p5 = pnand %p393_p4, %p387_p1 }
  0x30   :  { %293 = vmatpush3.bf16.msra.mxu1 %v320_v10 }
  0x31   :  { %294 = vmatprep.subr.bf16.mxu1 %v417_v0 }
  0x34   :  { %295 = vmatpush3.bf16.msra.mxu1 %v321_v11 }
  0x35   :  { %296 = vmatprep.subr.bf16.mxu1 %v417_v0 }
  0x38   :  { %297 = vmatpush3.bf16.msra.mxu1 %v322_v12 }
  0x39   :  { %298 = vmatprep.subr.bf16.mxu1 %v417_v0 }
  0x3c   :  { %299 = vmatpush3.bf16.msra.mxu1 %v323_v13 }
  0x3d   :  { %300 = vmatprep.subr.bf16.mxu1 %v417_v0 }
  0x40   :  { %301 = vmatpush3.bf16.msra.mxu1 %v324_v14 }
  0x41   :  { %302 = vmatprep.subr.bf16.mxu1 %v417_v0 }
  0x44   :  { %303 = vmatpush3.bf16.msra.mxu1 %v325_v15 }
  0xee   :  { %v122_v17 = vpop.f32.mrf.mxu0 }
  0xef   :  { %v123_v18 = vadd.f32 %v259_v16, %v122_v17 }
  0xf0   :  { %v286_v19 = vpop.f32.mrf.mxu0 }
  0xf1   :  { %v128_v20 = vmax.f32 %v123_v18, 0.0 }
  0xf2   :  { %v125_v21 = vpop.f32.mrf.mxu0 }
  0xf3   :  { %v129_v22 = vpack.c.bf16 %v128_v20, %v128_v20 }
  0xf4   :  { %v287_v23 = vpop.f32.mrf.mxu0 }
  0xf5   :  { %305 = vmatmul.mubr.bf16.vlgmr.msra.gmra.mxu1 %v129_v22 }
 0x1b5   :  { %v235_v25 = vpop.f32.mrf.mxu1 }
 0x1b6   :  { %v236_v26 = vadd.f32 %v262_v24, %v235_v25 }
 0x1b7   :  { %v306_v27 = vpop.f32.mrf.mxu1 }
 0x1b8   :  { %v241_v28 = vpack.c.bf16 %v236_v26, %v236_v26 }
 0x1b9   :  { %v238_v29 = vpop.f32.mrf.mxu1 }
 0x1ba   :  { %242 = vst [vmem:[#allocation8] sm:$0xf] %v241_v28 }
 0x1bb   :  { %v307_v30 = vpop.f32.mrf.mxu1 }
 0x1bc   :  { %397 = shalt.err (!%p394_p5)
}
 0x1bd   :  { %252 = dma.vmem_to_hbm [thread:$0]  %s250_s12, 64, %s474_s5, [#allocation4]  }
 0x1be   :  { %410 = dma.done.wait [#allocation4], 64  }
 0x1bf   :  { %411 = vsyncadd [#allocation4], 4294967232 }
 0x1c0   :  { %256 = vsyncpa [#allocation3], 1 }
 0x1c1   :  { %257 = vsyncpa [#allocation6], 1 }
 0x1c2   :  { %258 = vsyncpa [#allocation4], 1 }

</bundles_post_ra>
